<compile_context>
chip_gen: v7x
topology: tpu7x:2x2x1
jax: 0.10.0
libtpu: 0.0.40
codegen_flags: <defaults>
</compile_context>

<pallas_src>
import functools
import math

import jax
import jax.numpy as jnp
from jax.experimental import pallas as pl
from jax.experimental.pallas import tpu as pltpu

EPS = 1e-5


def _round_up(x, m):
    return (x + m - 1) // m * m


def prenorm_linear_kernel(x_ref, gamma_ref, beta_ref, w_ref, b_ref, o_ref,
                          y_ref, *, eps):
    # x_ref: (br, D); gamma/beta: (1, D); w_ref: (D, bc); b_ref: (1, bc);
    # o_ref: (br, bc); y_ref: (br, D) VMEM scratch holding LayerNorm(x).
    j = pl.program_id(1)

    @pl.when(j == 0)
    def _():
        x = x_ref[...].astype(jnp.float32)
        inv_d = 1.0 / x.shape[-1]
        # Single-pass mean / variance: one cross-lane reduce each (XLU),
        # var = E[x^2] - mean^2 on the VPU, rsqrt on the EUP slot.
        s = jnp.sum(x, axis=-1, keepdims=True)
        sq = jnp.sum(x * x, axis=-1, keepdims=True)
        mean = s * inv_d
        var = jnp.maximum(sq * inv_d - mean * mean, 0.0)
        x_hat = (x - mean) * jax.lax.rsqrt(var + eps)
        y = (x_hat * gamma_ref[...].astype(jnp.float32)
             + beta_ref[...].astype(jnp.float32))
        y_ref[...] = y.astype(y_ref.dtype)

    out = jnp.dot(y_ref[...], w_ref[...], preferred_element_type=jnp.float32)
    out = out + b_ref[...].astype(jnp.float32)
    o_ref[...] = out.astype(o_ref.dtype)


def prenorm_linear(x, gamma, beta, w, b, *,
                   block_rows=256, block_cols=512, matmul_dtype=None):
    """PreNorm(dim, Linear(dim, dim)) forward: Linear(LayerNorm(x)).

    x: (..., D).  Returns (..., D_out) with D_out = w.shape[1].
    matmul_dtype: None -> f32 matmul; jnp.bfloat16 recommended on v6e/v7x.
    """
    *lead, D = x.shape
    D_out = w.shape[1]
    rows = math.prod(lead) if lead else 1

    x2 = x.reshape(rows, D)
    gamma2 = gamma.reshape(1, D)
    beta2 = beta.reshape(1, D)
    bias2 = b.reshape(1, D_out)

    # --- row tiling: big tiles, pad the ragged last tile (rows discarded) ---
    br = _round_up(min(block_rows, _round_up(rows, 8)), 8)
    rows_p = _round_up(rows, br)
    if rows_p != rows:
        x2 = jnp.pad(x2, ((0, rows_p - rows), (0, 0)))

    # --- column tiling of W / bias / output (keeps W out of VMEM whole) ---
    if D_out <= block_cols:
        bc = D_out                                   # single full-extent tile
    else:
        bc = _round_up(min(block_cols, D_out), 128)  # lane-dense column tiles
    cols_p = _round_up(D_out, bc)
    w2 = w
    if cols_p != D_out:
        w2 = jnp.pad(w2, ((0, 0), (0, cols_p - D_out)))
        bias2 = jnp.pad(bias2, ((0, 0), (0, cols_p - D_out)))

    # bf16 MXU fast path: cast W in the wrapper so its DMA moves half the
    # bytes (W is the dominant HBM traffic); accumulation stays f32.
    acc_dtype = jnp.float32
    if matmul_dtype is not None:
        w2 = w2.astype(matmul_dtype)
        acc_dtype = matmul_dtype

    n_row = rows_p // br
    n_col = cols_p // bc

    kernel = functools.partial(prenorm_linear_kernel, eps=EPS)

    cost = pl.CostEstimate(
        flops=2 * rows_p * D * cols_p,
        transcendentals=rows_p,
        bytes_accessed=(x2.dtype.itemsize * x2.size
                        + w2.dtype.itemsize * w2.size * n_row
                        + 4 * (bias2.size + gamma2.size + beta2.size)
                        + x.dtype.itemsize * rows_p * cols_p),
    )

    out2 = pl.pallas_call(
        kernel,
        out_shape=jax.ShapeDtypeStruct((rows_p, cols_p), x.dtype),
        grid_spec=pltpu.PrefetchScalarGridSpec(
            num_scalar_prefetch=0,
            grid=(n_row, n_col),  # column axis fastest -> scratch reused per j
            in_specs=[
                pl.BlockSpec((br, D), lambda i, j: (i, 0)),   # x row tile
                pl.BlockSpec((1, D), lambda i, j: (0, 0)),    # gamma
                pl.BlockSpec((1, D), lambda i, j: (0, 0)),    # beta
                pl.BlockSpec((D, bc), lambda i, j: (0, j)),   # W column tile
                pl.BlockSpec((1, bc), lambda i, j: (0, j)),   # bias column tile
            ],
            out_specs=pl.BlockSpec((br, bc), lambda i, j: (i, j)),
            scratch_shapes=[pltpu.VMEM((br, D), acc_dtype)],  # LayerNorm(x)
        ),
        compiler_params=pltpu.CompilerParams(
            # Column axis carries the LayerNorm scratch -> "arbitrary".
            dimension_semantics=("parallel", "arbitrary"),
            vmem_limit_bytes=64 * 1024 * 1024,
        ),
        cost_estimate=cost,
    )(x2, gamma2, beta2, w2, bias2)

    out = out2[:rows, :D_out]
    return out.reshape(*lead, D_out)


def reference(x, gamma, beta, w, b, eps=EPS):
    x = x.astype(jnp.float32)
    mean = jnp.mean(x, axis=-1, keepdims=True)
    var = jnp.mean((x - mean) ** 2, axis=-1, keepdims=True)
    y = (x - mean) / jnp.sqrt(var + eps) * gamma + beta
    return jnp.einsum("...d,de->...e", y, w) + b


if __name__ == "__main__":
    # --- small shapes consistent with the module: batch=2, seq=8, dim=32 ---
    key = jax.random.PRNGKey(0)
    B, S, D = 2, 8, 32
    kx, kw, kb = jax.random.split(key, 3)
    x = jax.random.normal(kx, (B, S, D), dtype=jnp.float32)
    gamma = jnp.ones((D,), dtype=jnp.float32)    # torch LayerNorm default init
    beta = jnp.zeros((D,), dtype=jnp.float32)
    w = jax.random.normal(kw, (D, D), dtype=jnp.float32) * 0.05
    b = jax.random.normal(kb, (D,), dtype=jnp.float32) * 0.05

    out = jax.block_until_ready(prenorm_linear(x, gamma, beta, w, b))
    ref = reference(x, gamma, beta, w, b)
    assert out.shape == (B, S, D)
    assert jnp.allclose(out, ref, atol=5e-3, rtol=5e-3)

    # --- exercise the 2-D grid: ragged rows + multiple column tiles ---
    B2, S2, D2 = 2, 50, 256
    kx2, kw2, kb2, kg2, kbt2 = jax.random.split(jax.random.PRNGKey(1), 5)
    x_l = jax.random.normal(kx2, (B2, S2, D2), dtype=jnp.float32)
    gamma_l = 1.0 + 0.1 * jax.random.normal(kg2, (D2,), dtype=jnp.float32)
    beta_l = 0.1 * jax.random.normal(kbt2, (D2,), dtype=jnp.float32)
    w_l = jax.random.normal(kw2, (D2, D2), dtype=jnp.float32) * 0.05
    b_l = jax.random.normal(kb2, (D2,), dtype=jnp.float32) * 0.05

    ref_l = reference(x_l, gamma_l, beta_l, w_l, b_l)

    # f32 MXU path, small explicit tiles to cover multi-tile + row padding.
    out_l = jax.block_until_ready(
        prenorm_linear(x_l, gamma_l, beta_l, w_l, b_l,
                       block_rows=64, block_cols=128))
    assert out_l.shape == (B2, S2, D2)
    assert jnp.allclose(out_l, ref_l, atol=5e-3, rtol=5e-3)

    # bf16 MXU operands (v6e/v7x fast path), f32 accumulation.
    out_bf = jax.block_until_ready(
        prenorm_linear(x_l, gamma_l, beta_l, w_l, b_l,
                       block_rows=64, block_cols=128,
                       matmul_dtype=jnp.bfloat16))
    assert jnp.allclose(out_bf, ref_l, atol=5e-2, rtol=5e-2)

    print("KERNEL_OK")
</pallas_src>

<mosaic_0001>
module attributes {stable_mosaic.version = 11 : i64} {
  func.func @prenorm_linear_kernel(%arg0: i32, %arg1: i32, %arg2: memref<16x32xf32, #tpu.memory_space<vmem>>, %arg3: memref<1x32xf32, #tpu.memory_space<vmem>>, %arg4: memref<1x32xf32, #tpu.memory_space<vmem>>, %arg5: memref<32x32xf32, #tpu.memory_space<vmem>>, %arg6: memref<1x32xf32, #tpu.memory_space<vmem>>, %arg7: memref<16x32xf32, #tpu.memory_space<vmem>>, %arg8: memref<16x32xf32, #tpu.memory_space<vmem>>) attributes {dimension_semantics = [#tpu.dimension_semantics<parallel>, #tpu.dimension_semantics<arbitrary>], iteration_bounds = array<i64: 1, 1>, scalar_prefetch = 0 : i64, scratch_operands = 1 : i64, tpu.core_type = #tpu.core_type<tc>, window_params = [{transform_indices = @transform_0, window_bounds = array<i64: 16, 32>}, {pipeline_mode = #tpu.pipeline_mode<synchronous>, transform_indices = @transform_1, window_bounds = array<i64: 1, 32>}, {pipeline_mode = #tpu.pipeline_mode<synchronous>, transform_indices = @transform_2, window_bounds = array<i64: 1, 32>}, {transform_indices = @transform_3, window_bounds = array<i64: 32, 32>}, {transform_indices = @transform_4, window_bounds = array<i64: 1, 32>}, {transform_indices = @transform_5, window_bounds = array<i64: 16, 32>}]} {
    %c0_i32 = arith.constant 0 : i32
    %0 = arith.cmpi eq, %arg1, %c0_i32 : i32
    %1 = arith.extui %0 : i1 to i32
    %c0_i32_0 = arith.constant 0 : i32
    %2 = arith.cmpi ne, %1, %c0_i32_0 : i32
    scf.if %2 {
      %c0_8 = arith.constant 0 : index
      %c0_9 = arith.constant 0 : index
      %10 = vector.load %arg2[%c0_8, %c0_9] : memref<16x32xf32, #tpu.memory_space<vmem>>, vector<16x32xf32>
      %cst_10 = arith.constant dense<0.000000e+00> : vector<16xf32>
      %11 = vector.multi_reduction <add>, %10, %cst_10 [1] : vector<16x32xf32> to vector<16xf32>
      %12 = vector.shape_cast %11 : vector<16xf32> to vector<16x1xf32>
      %13 = arith.mulf %10, %10 : vector<16x32xf32>
      %cst_11 = arith.constant dense<0.000000e+00> : vector<16xf32>
      %14 = vector.multi_reduction <add>, %13, %cst_11 [1] : vector<16x32xf32> to vector<16xf32>
      %15 = vector.shape_cast %14 : vector<16xf32> to vector<16x1xf32>
      %cst_12 = arith.constant 3.125000e-02 : f32
      %16 = vector.broadcast %cst_12 : f32 to vector<16x1xf32>
      %17 = arith.mulf %12, %16 : vector<16x1xf32>
      %cst_13 = arith.constant 3.125000e-02 : f32
      %18 = vector.broadcast %cst_13 : f32 to vector<16x1xf32>
      %19 = arith.mulf %15, %18 : vector<16x1xf32>
      %20 = arith.mulf %17, %17 : vector<16x1xf32>
      %21 = arith.subf %19, %20 : vector<16x1xf32>
      %cst_14 = arith.constant 0.000000e+00 : f32
      %22 = vector.broadcast %cst_14 : f32 to vector<16x1xf32>
      %23 = arith.maximumf %21, %22 : vector<16x1xf32>
      %24 = vector.broadcast %17 : vector<16x1xf32> to vector<16x32xf32>
      %25 = arith.subf %10, %24 : vector<16x32xf32>
      %cst_15 = arith.constant 9.99999974E-6 : f32
      %26 = vector.broadcast %cst_15 : f32 to vector<16x1xf32>
      %27 = arith.addf %23, %26 : vector<16x1xf32>
      %28 = math.rsqrt %27 : vector<16x1xf32>
      %29 = vector.broadcast %28 : vector<16x1xf32> to vector<16x32xf32>
      %30 = arith.mulf %25, %29 : vector<16x32xf32>
      %c0_16 = arith.constant 0 : index
      %c0_17 = arith.constant 0 : index
      %31 = vector.load %arg3[%c0_16, %c0_17] : memref<1x32xf32, #tpu.memory_space<vmem>>, vector<1x32xf32>
      %32 = vector.broadcast %31 : vector<1x32xf32> to vector<16x32xf32>
      %33 = arith.mulf %30, %32 : vector<16x32xf32>
      %c0_18 = arith.constant 0 : index
      %c0_19 = arith.constant 0 : index
      %34 = vector.load %arg4[%c0_18, %c0_19] : memref<1x32xf32, #tpu.memory_space<vmem>>, vector<1x32xf32>
      %35 = vector.broadcast %34 : vector<1x32xf32> to vector<16x32xf32>
      %36 = arith.addf %33, %35 : vector<16x32xf32>
      %c0_20 = arith.constant 0 : index
      %c0_21 = arith.constant 0 : index
      %37 = vector.load %arg8[%c0_20, %c0_21] : memref<16x32xf32, #tpu.memory_space<vmem>>, vector<16x32xf32>
      tpu.vector_store %arg8[%c0_20, %c0_21], %36 {strides = array<i32>} : memref<16x32xf32, #tpu.memory_space<vmem>>, vector<16x32xf32>,
    } else {
    }
    %c0 = arith.constant 0 : index
    %c0_1 = arith.constant 0 : index
    %3 = vector.load %arg8[%c0, %c0_1] : memref<16x32xf32, #tpu.memory_space<vmem>>, vector<16x32xf32>
    %c0_2 = arith.constant 0 : index
    %c0_3 = arith.constant 0 : index
    %4 = vector.load %arg5[%c0_2, %c0_3] : memref<32x32xf32, #tpu.memory_space<vmem>>, vector<32x32xf32>
    %cst = arith.constant dense<0.000000e+00> : vector<16x32xf32>
    %5 = tpu.matmul %3, %4, %cst {dimension_numbers = #tpu.dot_dimension_numbers<[1], [0], [0], [1], [0, 0, 1, 1], [], []>} : vector<16x32xf32>, vector<32x32xf32>, vector<16x32xf32> -> vector<16x32xf32>
    %c0_4 = arith.constant 0 : index
    %c0_5 = arith.constant 0 : index
    %6 = vector.load %arg6[%c0_4, %c0_5] : memref<1x32xf32, #tpu.memory_space<vmem>>, vector<1x32xf32>
    %7 = vector.broadcast %6 : vector<1x32xf32> to vector<16x32xf32>
    %8 = arith.addf %5, %7 : vector<16x32xf32>
    %c0_6 = arith.constant 0 : index
    %c0_7 = arith.constant 0 : index
    %9 = vector.load %arg7[%c0_6, %c0_7] : memref<16x32xf32, #tpu.memory_space<vmem>>, vector<16x32xf32>
    tpu.vector_store %arg7[%c0_6, %c0_7], %8 {strides = array<i32>} : memref<16x32xf32, #tpu.memory_space<vmem>>, vector<16x32xf32>,
    return
  }
  func.func @transform_0(%arg0: i32, %arg1: i32) -> (i32, i32) {
    %c0_i32 = arith.constant 0 : i32
    %c0_i32_0 = arith.constant 0 : i32
    return %arg0, %c0_i32 : i32, i32
  }
  func.func @transform_1(%arg0: i32, %arg1: i32) -> (i32, i32) {
    %c0_i32 = arith.constant 0 : i32
    %c0_i32_0 = arith.constant 0 : i32
    %c0_i32_1 = arith.constant 0 : i32
    return %c0_i32, %c0_i32_0 : i32, i32
  }
  func.func @transform_2(%arg0: i32, %arg1: i32) -> (i32, i32) {
    %c0_i32 = arith.constant 0 : i32
    %c0_i32_0 = arith.constant 0 : i32
    %c0_i32_1 = arith.constant 0 : i32
    return %c0_i32, %c0_i32_0 : i32, i32
  }
  func.func @transform_3(%arg0: i32, %arg1: i32) -> (i32, i32) {
    %c0_i32 = arith.constant 0 : i32
    %c0_i32_0 = arith.constant 0 : i32
    return %c0_i32, %arg1 : i32, i32
  }
  func.func @transform_4(%arg0: i32, %arg1: i32) -> (i32, i32) {
    %c0_i32 = arith.constant 0 : i32
    %c0_i32_0 = arith.constant 0 : i32
    return %c0_i32, %arg1 : i32, i32
  }
  func.func @transform_5(%arg0: i32, %arg1: i32) -> (i32, i32) {
    %c0_i32 = arith.constant 0 : i32
    return %arg0, %arg1 : i32, i32
  }
}

</mosaic_0001>

<bundles_post_ra>
// kernel: tpu_custom_call.1
= control target key start
LH: loop header
LB: loop body
LE: loop exit
PB: predicated region body
PF: predicated region fallthrough
CT: control target
= control target key end

     0   :  { %10 = vsyncpa [#allocation4], 0  ;;  %s569_s0 = inlined_call_operand.hbm [shape: f32[16,32], index: 0, kind: input, shape index: {}]   ;;  %s570_s1 = inlined_call_operand.hbm [shape: f32[1,32], index: 1, kind: input, shape index: {}]   ;;  %s571_s2 = inlined_call_operand.hbm [shape: f32[1,32], index: 2, kind: input, shape index: {}]   ;;  %s572_s3 = inlined_call_operand.hbm [shape: f32[32,32], index: 3, kind: input, shape index: {}]   ;;  %s573_s4 = inlined_call_operand.hbm [shape: f32[1,32], index: 4, kind: input, shape index: {}]   ;;  %s574_s5 = inlined_call_operand.hbm [shape: f32[16,32], index: 5, kind: output, shape index: {}]  }
   0x1   :  { %11 = vsyncpa [#allocation7], 0 }
   0x2   :  { %12 = vsyncpa [#allocation10], 0 }
   0x3   :  { %13 = vsyncpa [#allocation5], 0  ;;  %s440_s18 = smov [#allocation6]   ;;  %s300_s22 = scalar_lea.hbm %s570_s1, 16 }
   0x4   :  { %s32_s19 = sshll.u32 %s440_s18, 4  ;;  %p301_p0 = scmp.ne.s32.totalorder %s570_s1, %s300_s22  ;;  %s33_s19 = int_to_ptr.vmem [resolvable:$true] %s32_s19 }
   0x5   :  { %p304_p1 = scmp.lt.u32.totalorder %s300_s22, %s570_s1 }
   0x7   :  { %p306_p2 = pnand %p304_p1, %p301_p0 }
   0x9   :  { %309 = shalt.err (!%p306_p2)
}
   0xa   :  { %s310_s27 = scalar_lea.vmem %s33_s19, 16  ;;  %s314_s28 = scalar_lea.vmem %s33_s19, 32 }
   0xb   :  { %p311_p3 = scmp.ne.s32.totalorder %s33_s19, %s310_s27  ;;  %p315_p4 = scmp.lt.s32.totalorder %s33_s19, %s33_s19 }
   0xc   :  { %p316_p5 = scmp.lt.s32.totalorder %s314_s28, %s310_s27 }
   0xe   :  { %p317_p6 = por %p316_p5, %p315_p4 }
  0x10   :  { %p318_p7 = pnand %p317_p6, %p311_p3 }
  0x12   :  { %321 = shalt.err (!%p318_p7)
}
  0x13   :  { %35 = dma.hbm_to_vmem [thread:$0]  %s570_s1, 16, %s33_s19, [#allocation7]  }
  0x14   :  { %s441_s6 = smov [#allocation9]   ;;  %s442_s8 = smov [#allocation3]  }
  0x15   :  { %s51_s7 = sshll.u32 %s441_s6, 4  ;;  %s19_s9 = sshll.u32 %s442_s8, 4  ;;  %s52_s7 = int_to_ptr.vmem [resolvable:$true] %s51_s7  ;;  %s20_s9 = int_to_ptr.vmem [resolvable:$true] %s19_s9 }
  0x16   :  { %s322_s12 = scalar_lea.hbm %s572_s3, 512 }
  0x17   :  { %p323_p8 = scmp.ne.s32.totalorder %s572_s3, %s322_s12  ;;  %p326_p9 = scmp.lt.u32.totalorder %s322_s12, %s572_s3 }
  0x19   :  { %p328_p10 = pnand %p326_p9, %p323_p8 }
  0x1b   :  { %331 = shalt.err (!%p328_p10)
}
  0x1c   :  { %s332_s1 = scalar_lea.vmem %s52_s7, 512  ;;  %p337_p12 = scmp.lt.s32.totalorder %s52_s7, %s52_s7 }
  0x1d   :  { %p333_p11 = scmp.ne.s32.totalorder %s52_s7, %s332_s1  ;;  %p338_p13 = scmp.lt.s32.totalorder %s332_s1, %s332_s1 }
  0x1f   :  { %p339_p0 = por %p338_p13, %p337_p12 }
  0x21   :  { %p340_p1 = pnand %p339_p0, %p333_p11 }
  0x23   :  { %343 = shalt.err (!%p340_p1)
}
  0x24   :  { %s443_s17 = smov 128   ;;  %s444_s18 = smov 8  }
  0x25   :  { %57 = dma.hbm_to_vmem [thread:$0]  %s572_s3, 512, %s52_s7, [#allocation10], %s443_s17, %s443_s17, %s444_s18  }
  0x26   :  { %s344_s23 = scalar_lea.hbm %s569_s0, 256 }
  0x27   :  { %p345_p2 = scmp.ne.s32.totalorder %s569_s0, %s344_s23  ;;  %p348_p3 = scmp.lt.u32.totalorder %s344_s23, %s569_s0 }
  0x29   :  { %p350_p4 = pnand %p348_p3, %p345_p2 }
  0x2b   :  { %353 = shalt.err (!%p350_p4)
}
  0x2c   :  { %s354_s28 = scalar_lea.vmem %s20_s9, 256  ;;  %p359_p6 = scmp.lt.s32.totalorder %s20_s9, %s20_s9 }
  0x2d   :  { %p355_p5 = scmp.ne.s32.totalorder %s20_s9, %s354_s28  ;;  %p360_p7 = scmp.lt.s32.totalorder %s354_s28, %s354_s28 }
  0x2f   :  { %p361_p8 = por %p360_p7, %p359_p6 }
  0x31   :  { %p362_p9 = pnand %p361_p8, %p355_p5 }
  0x33   :  { %365 = shalt.err (!%p362_p9)
}
  0x34   :  { %25 = dma.hbm_to_vmem [thread:$0]  %s569_s0, 256, %s20_s9, [#allocation4], %s443_s17, %s443_s17, %s444_s18  }
  0x35   :  { %s445_s30 = smov [#allocation8]   ;;  %s446_s7 = smov [#allocation11]  }
  0x36   :  { %s42_s6 = sshll.u32 %s445_s30, 4  ;;  %s64_s8 = sshll.u32 %s446_s7, 4  ;;  %s43_s6 = int_to_ptr.vmem [resolvable:$true] %s42_s6  ;;  %s65_s8 = int_to_ptr.vmem [resolvable:$true] %s64_s8 }
  0x37   :  { %s366_s12 = scalar_lea.hbm %s571_s2, 16 }
  0x38   :  { %p367_p10 = scmp.ne.s32.totalorder %s571_s2, %s366_s12  ;;  %p370_p11 = scmp.lt.u32.totalorder %s366_s12, %s571_s2 }
  0x3a   :  { %p372_p12 = pnand %p370_p11, %p367_p10 }
  0x3c   :  { %375 = shalt.err (!%p372_p12)
}
  0x3d   :  { %s376_s0 = scalar_lea.vmem %s43_s6, 16  ;;  %s380_s9 = scalar_lea.vmem %s43_s6, 32 }
  0x3e   :  { %p377_p13 = scmp.ne.s32.totalorder %s43_s6, %s376_s0  ;;  %p381_p0 = scmp.lt.s32.totalorder %s43_s6, %s43_s6 }
  0x3f   :  { %p382_p1 = scmp.lt.s32.totalorder %s380_s9, %s376_s0 }
  0x41   :  { %p383_p2 = por %p382_p1, %p381_p0 }
  0x43   :  { %p384_p3 = pnand %p383_p2, %p377_p13 }
  0x45   :  { %387 = shalt.err (!%p384_p3)
}
  0x46   :  { %45 = dma.hbm_to_vmem [thread:$0]  %s571_s2, 16, %s43_s6, [#allocation7]  }
  0x47   :  { %s388_s22 = scalar_lea.hbm %s573_s4, 16 }
  0x48   :  { %p389_p4 = scmp.ne.s32.totalorder %s573_s4, %s388_s22  ;;  %p392_p5 = scmp.lt.u32.totalorder %s388_s22, %s573_s4 }
  0x4a   :  { %p394_p6 = pnand %p392_p5, %p389_p4 }
  0x4c   :  { %397 = shalt.err (!%p394_p6)
}
  0x4d   :  { %s398_s27 = scalar_lea.vmem %s65_s8, 16  ;;  %s402_s28 = scalar_lea.vmem %s65_s8, 32 }
  0x4e   :  { %p399_p7 = scmp.ne.s32.totalorder %s65_s8, %s398_s27  ;;  %p403_p8 = scmp.lt.s32.totalorder %s65_s8, %s65_s8 }
  0x4f   :  { %p404_p9 = scmp.lt.s32.totalorder %s402_s28, %s398_s27 }
  0x51   :  { %p405_p10 = por %p404_p9, %p403_p8 }
  0x53   :  { %p406_p11 = pnand %p405_p10, %p399_p7 }
  0x55   :  { %409 = shalt.err (!%p406_p11)
}
  0x56   :  { %67 = dma.hbm_to_vmem [thread:$0]  %s573_s4, 16, %s65_s8, [#allocation10]  }
  0x57   :  { %432 = dma.done.wait [#allocation4], 256  }
  0x58   :  { %433 = vsyncadd [#allocation4], 4294967040 }
  0x59   :  { %434 = dma.done.wait [#allocation7], 32  }
  0x5a   :  { %435 = vsyncadd [#allocation7], 4294967264 }
  0x5b   :  { %436 = dma.done.wait [#allocation10], 528  }
  0x5c   :  { %437 = vsyncadd [#allocation10], 4294966768  ;;  %vm89_vm0 = vcmask 261120   ;;  %v87_v0 = vld [vmem:[#allocation3] sm:$0xff]  ;;  %v88_v1 = vld [vmem:[#allocation3 + $0x8] sm:$0xff]  ;;  %s447_s4 = smov [#allocation12]  }
  0x5d   :  { %v90_v2 = vsel %vm89_vm0, %v87_v0, 0.0  ;;  %v96_v3 = vmul.f32 %v87_v0, %v87_v0  ;;  %v97_v4 = vmul.f32 %v88_v1, %v88_v1  ;;  %v93_v6 = vsel %vm89_vm0, %v88_v1, 0.0  ;;  %v144_v8 = vld [vmem:[#allocation9] sm:$0xff]  ;;  %v145_v9 = vld [vmem:[#allocation9 + $0x8] sm:$0xff]  ;;  %v146_v11 = vld [vmem:[#allocation9 + $0x10] sm:$0xff]  ;;  %s244_s29 = sshll.u32 %s447_s4, 4  ;;  %s245_s29 = int_to_ptr.vmem [resolvable:$true] %s244_s29 }
  0x5e   :  { %91 = vadd.xlane.f32.xlu0 %v90_v2  ;;  %v280_v10 = vpack.c.bf16 %v145_v9, %v144_v8  ;;  %v147_v12 = vld [vmem:[#allocation9 + $0x18] sm:$0xff]  ;;  %v260_v44 = vld [vmem:[#allocation11] ss:$0 sm:$0xff]  ;;  %s410_s30 = scalar_lea.vmem %s245_s29, 256  ;;  %p415_p13 = scmp.lt.s32.totalorder %s245_s29, %s245_s29 }
  0x5f   :  { %v98_v5 = vsel %vm89_vm0, %v96_v3, 0.0  ;;  %v101_v7 = vsel %vm89_vm0, %v97_v4, 0.0  ;;  %v284_v13 = vpack.c.bf16 %v147_v12, %v146_v11  ;;  %v258_v32 = vld [vmem:[#allocation6] ss:$0 sm:$0xff]  ;;  %v259_v34 = vld [vmem:[#allocation8] ss:$0 sm:$0xff]  ;;  %p411_p12 = scmp.ne.s32.totalorder %s245_s29, %s410_s30  ;;  %p416_p0 = scmp.lt.s32.totalorder %s410_s30, %s410_s30 }
  0x60   :  { %99 = vadd.xlane.f32.xlu1 %v98_v5  ;;  %281 = vmatprep.subr.bf16.mxu0 %v280_v10 }
  0x61   :  { %283 = vmatpush3.bf16.msra.mxu0 %v280_v10  ;;  %p417_p1 = por %p416_p0, %p415_p13 }
  0x62   :  { %94 = vadd.xlane.f32.xlu0 %v93_v6  ;;  %285 = vmatprep.subr.bf16.mxu0 %v284_v13 }
  0x63   :  { %p418_p2 = pnand %p417_p1, %p411_p12 }
  0x64   :  { %102 = vadd.xlane.f32.xlu1 %v101_v7 }
  0x65   :  { %287 = vmatpush3.bf16.msra.mxu0 %v284_v13 }
  0xeb   :  { %v92_v14 = vpop.xlane.xlu0 %91 }
  0xec   :  { %v104_v15 = vmul.f32 0.03125, %v92_v14 }
  0xed   :  { %v100_v16 = vpop.xlane.xlu1 %99 }
  0xee   :  { %v108_v17 = vmul.f32 %v104_v15, %v104_v15  ;;  %v106_v18 = vmul.f32 0.03125, %v100_v16  ;;  %v114_v30 = vsub.f32 %v87_v0, %v104_v15 }
  0xef   :  { %v95_v19 = vpop.xlane.xlu0 %94 }
  0xf0   :  { %v110_v20 = vsub.f32 %v106_v18, %v108_v17  ;;  %v105_v21 = vmul.f32 0.03125, %v95_v19 }
  0xf1   :  { %v103_v22 = vpop.xlane.xlu1 %102 }
  0xf2   :  { %v112_v23 = vmax.f32 %v110_v20, 0.0  ;;  %v109_v24 = vmul.f32 %v105_v21, %v105_v21  ;;  %v107_v25 = vmul.f32 0.03125, %v103_v22  ;;  %v115_v36 = vsub.f32 %v88_v1, %v105_v21 }
  0xf4   :  { %v116_v26 = vadd.f32 1e-05, %v112_v23  ;;  %v111_v27 = vsub.f32 %v107_v25, %v109_v24 }
  0xf6   :  { %296 = vrsqrt.f32 %v116_v26  ;;  %v113_v28 = vmax.f32 %v111_v27, 0.0 }
  0xf8   :  { %v117_v29 = vadd.f32 1e-05, %v113_v28 }
  0xfa   :  { %298 = vrsqrt.f32 %v117_v29 }
 0x100   :  { %v297_v31 = vpop.eup %296 }
 0x101   :  { %v120_v33 = vmul.f32 %v297_v31, %v114_v30 }
 0x103   :  { %v129_v35 = vmul.f32 %v258_v32, %v120_v33 }
 0x104   :  { %v299_v37 = vpop.eup %298 }
 0x105   :  { %v138_v38 = vadd.f32 %v259_v34, %v129_v35  ;;  %v121_v39 = vmul.f32 %v299_v37, %v115_v36 }
 0x107   :  { %140 = vst.msk [vmem:[#allocation2] sm:$0xff] %vm89_vm0, %v138_v38  ;;  %v130_v40 = vmul.f32 %v258_v32, %v121_v39 }
 0x109   :  { %v139_v41 = vadd.f32 %v259_v34, %v130_v40 }
 0x10b   :  { %141 = vst.msk [vmem:[#allocation2 + $0x8] sm:$0xff] %vm89_vm0, %v139_v41 }
 0x10e   :  { %v142_v42 = vld [vmem:[#allocation2] sm:$0xff] }
 0x10f   :  { %277 = vmatprep.mubr.msk.f32.mxu0 %vm89_vm0, %v142_v42 }
 0x112   :  { %v143_v43 = vld [vmem:[#allocation2 + $0x8] sm:$0xff] }
 0x113   :  { %278 = vmatmul.mubr.msk.f32.vlgmr.msra.gmra.mrb[0].mxu0 %vm89_vm0, %v143_v43 }
 0x1e6   :  { %v279_v45 = vpop.f32.mrb[0].mxu0 }
 0x1e7   :  { %v234_v46 = vadd.f32 %v279_v45, %v260_v44  ;;  %v228_v47 = vpop.f32.mrb[1].mxu0 }
 0x1e8   :  { %v229_v48 = vadd.f32 %v260_v44, %v228_v47 }
 0x1e9   :  { %238 = vst.msk [vmem:[#allocation12 + $0x8] sm:$0xff] %vm89_vm0, %v234_v46 }
 0x1ea   :  { %237 = vst.msk [vmem:[#allocation12] sm:$0xff] %vm89_vm0, %v229_v48 }
 0x1eb   :  { %421 = shalt.err (!%p418_p2)
}
 0x1ec   :  { %s422_s8 = scalar_lea.hbm %s574_s5, 256 }
 0x1ed   :  { %p423_p3 = scmp.ne.s32.totalorder %s574_s5, %s422_s8  ;;  %p426_p4 = scmp.lt.u32.totalorder %s422_s8, %s574_s5 }
 0x1ef   :  { %p428_p5 = pnand %p426_p4, %p423_p3 }
 0x1f1   :  { %431 = shalt.err (!%p428_p5)
}
 0x1f2   :  { %250 = dma.vmem_to_hbm [thread:$0]  %s245_s29, 256, %s574_s5, [#allocation5], %s443_s17, %s443_s17, %s444_s18  }
 0x1f3   :  { %438 = dma.done.wait [#allocation5], 256  }
 0x1f4   :  { %439 = vsyncadd [#allocation5], 4294967040 }
 0x1f5   :  { %254 = vsyncpa [#allocation4], 1 }
 0x1f6   :  { %255 = vsyncpa [#allocation7], 1 }
 0x1f7   :  { %256 = vsyncpa [#allocation10], 1 }
 0x1f8   :  { %257 = vsyncpa [#allocation5], 1 }

</bundles_post_ra>
